<compile_context>
chip_gen: v6e
topology: v6e:2x2x1
jax: 0.10.0
libtpu: 0.0.40
codegen_flags: <defaults>
</compile_context>

<pallas_src>
import numpy as np
import jax
import jax.numpy as jnp
from jax.experimental import pallas as pl
from jax.experimental.pallas import tpu as pltpu

KSIZE = 3
LRELU_SLOPE = 0.2                 # activation_funcs['lrelu'].fn slope
ACT_GAIN = float(np.sqrt(2.0))    # activation_funcs['lrelu'].def_gain
CLAMP = 256.0                     # clamp_gain(x, g, c) = clamp(x * g, -c, c), c = 256 * gain


def _prologue_kernel(s1t_ref, dcoefg_ref, s2_ref, pt_ref, w1t_ref, nb_ref,
                     wrgbbd_ref, brgb_ref, x_ref, img_ref):
    bt, c, rr = x_ref.shape
    nine_c = w1t_ref.shape[1]
    img_c = brgb_ref.shape[0]

    # -------- conv1 (SynthesisLayer2): modulated 3x3 conv as ONE stacked-M MXU matmul --------
    # wmod[bt*C, 9C] = W_flat * style (already in the matmul dtype; cast hoisted to wrapper).
    wmod = (w1t_ref[...][None, :, :] * s1t_ref[...][:, None, :]).reshape(bt * c, nine_c)
    y = jnp.dot(wmod, pt_ref[...], preferred_element_type=jnp.float32)     # [bt*C, R*R]
    y = y.reshape(bt, c, rr)

    # demod*gain  +  gain*(noise + bias)  ->  lrelu  ->  clamp   (gain folded in wrapper)
    y = y * dcoefg_ref[...] + nb_ref[...][None, :, :]
    y = jnp.where(y >= 0.0, y, LRELU_SLOPE * y)
    y = jnp.clip(y, -CLAMP, CLAMP)
    x_ref[...] = y.astype(x_ref.dtype)                                     # lane-dense [bt, C, R*R]

    # -------- torgb (ToRGBLayer2): 1x1 modulated conv (demodulate=False) --------
    # Style-modulate on the VPU, then one shared block-diagonal f32 matmul (no per-sample
    # M=3 matmuls, no bf16 cast of y).
    ys = (y * s2_ref[...]).reshape(bt * c, rr)                              # [bt*C, R*R]
    img = jnp.dot(wrgbbd_ref[...], ys, preferred_element_type=jnp.float32)  # [bt*IMG, R*R]
    img = img.reshape(bt, img_c, rr) + brgb_ref[...][None, :, :]
    img_ref[...] = jnp.clip(img, -CLAMP, CLAMP).astype(img_ref.dtype)


def synthesis_prologue(ws, params, *, b_tile=None, use_bf16=False, out_dtype=jnp.float32):
    """ws: [B, 2, w_dim] float32. Returns (x, img) in NCHW like the PyTorch module."""
    B, num_ws, W = ws.shape
    assert num_ws >= 2
    C, R, _ = params['const'].shape
    IMG = params['torgb_w'].shape[0]
    RR = R * R
    hp = jax.lax.Precision.HIGHEST

    # ---- batch tile selection ----
    # Constraint: b_tile divides B and (b_tile % 8 == 0 or b_tile == B) for the 2-D style input.
    # Prefer large tiles (amortize ~0.35us/step fixed overhead, fill MXU M rows) while keeping
    # n_tiles >= 2 so v7x's two TensorCores both get work via the "parallel" grid axis.
    if b_tile is None:
        if B % 8 != 0:
            b_tile = B
        else:
            cands = [t for t in (64, 32, 16, 8) if B % t == 0]
            multi = [t for t in cands if B // t >= 2]
            b_tile = multi[0] if multi else cands[0]
    assert B % b_tile == 0 and (b_tile == B or b_tile % 8 == 0)
    n_tiles = B // b_tile

    # ---- hoisted per-batch style / demod math (tiny XLA matmuls) ----
    fc_gain = 1.0 / np.sqrt(W)
    s1 = jnp.dot(ws[:, 0, :], params['aff1_w'].T * fc_gain, precision=hp) \
        + params['aff1_b'][None, :]                                        # [B, C]
    wg2 = 1.0 / np.sqrt(C)                                                 # torgb weight_gain (k=1)
    s2 = (jnp.dot(ws[:, 1, :], params['aff2_w'].T * fc_gain, precision=hp)
          + params['aff2_b'][None, :]) * wg2                               # [B, C]

    # demod: dcoef[b,o] = rsqrt(sum_{i,k} (W[o,i,k]*s1[b,i])^2 + 1e-8) = rsqrt(s1^2 @ wsq^T + eps)
    wsq = jnp.sum(params['conv1_w'] ** 2, axis=(2, 3))                     # [Cout, Cin]
    dcoef = jax.lax.rsqrt(jnp.dot(s1 * s1, wsq.T, precision=hp) + 1e-8)    # [B, Cout]
    # fold the activation gain into the demod coefficient (lrelu is positively homogeneous)
    dcoefg = (dcoef * ACT_GAIN).reshape(B, C, 1)                           # C on sublanes
    s2c = s2.reshape(B, C, 1)

    # ---- im2col of the shared const input (transposed: pixels on lanes) ----
    cpad = jnp.pad(params['const'], ((0, 0), (1, 1), (1, 1)))              # [C, R+2, R+2]
    taps = [cpad[:, ky:ky + R, kx:kx + R].reshape(C, RR)
            for ky in range(KSIZE) for kx in range(KSIZE)]
    pt = jnp.concatenate(taps, axis=0)                                     # [9C, R*R]

    # conv1 weight flattened to [Cout, 9*Cin] with (ky, kx, cin) column order
    w1t = jnp.transpose(params['conv1_w'], (0, 2, 3, 1)).reshape(C, KSIZE * KSIZE * C)
    s1t = jnp.tile(s1, (1, KSIZE * KSIZE))                                 # [B, 9C]

    # combined, gain-folded noise+bias slab: nb[c, r] = ACT_GAIN * (noise[r] + bias[c])
    noise_flat = (params['noise_const'] * params['noise_strength'][0]).reshape(1, RR)
    nb = ACT_GAIN * (noise_flat + params['conv1_b'].reshape(C, 1))          # [C, R*R]

    wrgb = params['torgb_w'].reshape(IMG, C)
    # shared block-diagonal ToRGB weight: one [bt*IMG, bt*C] matmul per tile instead of bt
    # tiny M=3 matmuls (constant across grid steps -> DMA'd once).
    wrgb_bd = jnp.kron(jnp.eye(b_tile, dtype=jnp.float32), wrgb)            # [bt*IMG, bt*C]
    brgb = params['torgb_b'].reshape(IMG, 1)

    # matmul-operand dtype for the big conv matmul; casts hoisted out of the kernel
    mm_dtype = jnp.bfloat16 if use_bf16 else jnp.float32
    pt = pt.astype(mm_dtype)
    w1t = w1t.astype(mm_dtype)
    s1t = s1t.astype(mm_dtype)

    nine_c = KSIZE * KSIZE * C
    in_specs = [
        pl.BlockSpec((b_tile, nine_c), lambda g: (g, 0)),       # s1t (tiled styles)
        pl.BlockSpec((b_tile, C, 1), lambda g: (g, 0, 0)),      # dcoef * ACT_GAIN
        pl.BlockSpec((b_tile, C, 1), lambda g: (g, 0, 0)),      # s2 (torgb styles)
        pl.BlockSpec((nine_c, RR), lambda g: (0, 0)),           # im2col(const), transposed
        pl.BlockSpec((C, nine_c), lambda g: (0, 0)),            # conv1 weight [Cout, 9Cin]
        pl.BlockSpec((C, RR), lambda g: (0, 0)),                # ACT_GAIN*(noise + bias)
        pl.BlockSpec((b_tile * IMG, b_tile * C), lambda g: (0, 0)),  # block-diag torgb weight
        pl.BlockSpec((IMG, 1), lambda g: (0, 0)),               # torgb bias
    ]
    out_specs = [
        pl.BlockSpec((b_tile, C, RR), lambda g: (g, 0, 0)),     # x   (NCHW-flat, lane-dense)
        pl.BlockSpec((b_tile, IMG, RR), lambda g: (g, 0, 0)),   # img (NCHW-flat, lane-dense)
    ]
    out_shape = [jax.ShapeDtypeStruct((B, C, RR), out_dtype),
                 jax.ShapeDtypeStruct((B, IMG, RR), out_dtype)]

    # ---- explicit VMEM budget (v7x has only 64 MiB physical / 32 MiB scoped default) ----
    bpe = 2 if use_bf16 else 4
    obpe = jnp.dtype(out_dtype).itemsize
    in_bytes = (b_tile * nine_c * bpe + 2 * b_tile * C * 4 + nine_c * RR * bpe
                + C * nine_c * bpe + C * RR * 4 + (b_tile * IMG) * (b_tile * C) * 4 + IMG * 4)
    out_bytes = b_tile * C * RR * obpe + b_tile * IMG * RR * obpe
    interm = (b_tile * C * nine_c * bpe          # wmod
              + 3 * b_tile * C * RR * 4          # y / ys / temps
              + b_tile * IMG * RR * 4)
    est = 2 * (in_bytes + out_bytes) + interm
    vmem_cap = int(max(32 << 20, min(2 * est, 56 << 20)))

    x_flat, img_flat = pl.pallas_call(
        _prologue_kernel,
        out_shape=out_shape,
        grid_spec=pltpu.PrefetchScalarGridSpec(
            num_scalar_prefetch=0,
            grid=(n_tiles,),
            in_specs=in_specs,
            out_specs=out_specs,
        ),
        compiler_params=pltpu.CompilerParams(
            dimension_semantics=("parallel",),
            vmem_limit_bytes=vmem_cap,
        ),
    )(s1t, dcoefg, s2c, pt, w1t, nb, wrgb_bd, brgb)

    # NCHW: pure reshapes (no transposes / extra HBM passes)
    x = x_flat.reshape(B, C, R, R)
    img = img_flat.reshape(B, IMG, R, R)
    return x, img


def reference(ws, p):
    """Pure-JAX NCHW reference mirroring the PyTorch forward (noise_mode='const')."""
    B, _, W = ws.shape
    C, R, _ = p['const'].shape
    IMG = p['torgb_w'].shape[0]
    hp = jax.lax.Precision.HIGHEST

    x = jnp.tile(p['const'][None], (B, 1, 1, 1))                           # [B, C, R, R]
    w0, w1 = ws[:, 0, :], ws[:, 1, :]

    # conv1: modulated_conv2d(demodulate=True, padding=1)
    styles = jnp.dot(w0, p['aff1_w'].T * (1.0 / np.sqrt(W)), precision=hp) + p['aff1_b']
    wmod = p['conv1_w'][None] * styles[:, None, :, None, None]             # [B, Co, Ci, 3, 3]
    dcoef = jax.lax.rsqrt(jnp.sum(wmod ** 2, axis=(2, 3, 4)) + 1e-8)
    wmod = wmod * dcoef[:, :, None, None, None]

    def conv3(xi, wi):
        return jax.lax.conv_general_dilated(
            xi[None], wi, (1, 1), ((1, 1), (1, 1)),
            dimension_numbers=('NCHW', 'OIHW', 'NCHW'), precision=hp)[0]
    x = jax.vmap(conv3)(x, wmod)

    noise = p['noise_const'] * p['noise_strength'][0]
    x = x + noise[None, None]
    x = x + p['conv1_b'][None, :, None, None]
    x = jnp.where(x >= 0.0, x, LRELU_SLOPE * x)
    x = jnp.clip(x * ACT_GAIN, -CLAMP, CLAMP)

    # torgb: modulated_conv2d(demodulate=False, k=1)
    styles2 = (jnp.dot(w1, p['aff2_w'].T * (1.0 / np.sqrt(W)), precision=hp)
               + p['aff2_b']) * (1.0 / np.sqrt(C))
    wmod2 = p['torgb_w'][None] * styles2[:, None, :, None, None]           # [B, IMG, C, 1, 1]

    def conv1x1(xi, wi):
        return jax.lax.conv_general_dilated(
            xi[None], wi, (1, 1), 'VALID',
            dimension_numbers=('NCHW', 'OIHW', 'NCHW'), precision=hp)[0]
    img = jax.vmap(conv1x1)(x, wmod2)
    img = jnp.clip(img + p['torgb_b'][None, :, None, None], -CLAMP, CLAMP)
    return x, img


if __name__ == "__main__":
    C, W, R, IMG = 32, 32, 16, 3   # out_channels, w_dim, resolution, img_channels

    key = jax.random.PRNGKey(0)
    ks = jax.random.split(key, 8)
    params = {
        'const':          jax.random.normal(ks[0], (C, R, R), jnp.float32),
        'aff1_w':         jax.random.normal(ks[1], (C, W), jnp.float32),
        'aff1_b':         jnp.ones((C,), jnp.float32),          # bias_init=1
        'conv1_w':        jax.random.normal(ks[2], (C, C, KSIZE, KSIZE), jnp.float32),
        'noise_const':    jax.random.normal(ks[3], (R, R), jnp.float32),
        'noise_strength': jnp.full((1,), 0.1, jnp.float32),      # nonzero: exercise noise path
        'conv1_b':        jnp.zeros((C,), jnp.float32),
        'aff2_w':         jax.random.normal(ks[4], (C, W), jnp.float32),
        'aff2_b':         jnp.ones((C,), jnp.float32),          # bias_init=1
        'torgb_w':        jax.random.normal(ks[5], (IMG, C, 1, 1), jnp.float32),
        'torgb_b':        jnp.zeros((IMG,), jnp.float32),
    }

    # ---- small batch (B=2): single-tile path, strict f32 check ----
    B = 2
    ws = jax.random.normal(ks[6], (B, 2, W), jnp.float32)
    x_ref, img_ref = reference(ws, params)
    x, img = synthesis_prologue(ws, params)
    jax.block_until_ready((x, img))
    np.testing.assert_allclose(np.asarray(x), np.asarray(x_ref), atol=2e-3, rtol=2e-3)
    np.testing.assert_allclose(np.asarray(img), np.asarray(img_ref), atol=2e-3, rtol=2e-3)

    # ---- larger batch (B=16): multi-tile grid (2 tiles of 8), strict f32 check ----
    B2 = 16
    ws2 = jax.random.normal(ks[7], (B2, 2, W), jnp.float32)
    x_ref2, img_ref2 = reference(ws2, params)
    x2, img2 = synthesis_prologue(ws2, params)
    jax.block_until_ready((x2, img2))
    np.testing.assert_allclose(np.asarray(x2), np.asarray(x_ref2), atol=2e-3, rtol=2e-3)
    np.testing.assert_allclose(np.asarray(img2), np.asarray(img_ref2), atol=2e-3, rtol=2e-3)

    # ---- bf16 matmul-operand path (MXU rate on v6e/v7x); elementwise/demod stays f32 ----
    x16, img16 = synthesis_prologue(ws2, params, use_bf16=True)
    jax.block_until_ready((x16, img16))
    np.testing.assert_allclose(np.asarray(x16), np.asarray(x_ref2), atol=5e-1, rtol=1e-1)
    np.testing.assert_allclose(np.asarray(img16), np.asarray(img_ref2), atol=5e-1, rtol=1e-1)

    # ---- bf16 outputs (writeback-bound regime): smoke test only ----
    xb, imgb = synthesis_prologue(ws2, params, use_bf16=True, out_dtype=jnp.bfloat16)
    jax.block_until_ready((xb, imgb))
    assert xb.shape == (B2, C, R, R) and imgb.shape == (B2, IMG, R, R)
    assert bool(jnp.all(jnp.isfinite(xb.astype(jnp.float32)))) \
        and bool(jnp.all(jnp.isfinite(imgb.astype(jnp.float32))))

    print("KERNEL_OK")
</pallas_src>

<mosaic_0001>
module attributes {stable_mosaic.version = 11 : i64} {
  func.func @_prologue_kernel(%arg0: i32, %arg1: memref<2x288xf32, #tpu.memory_space<vmem>>, %arg2: memref<2x32x1xf32, #tpu.memory_space<vmem>>, %arg3: memref<2x32x1xf32, #tpu.memory_space<vmem>>, %arg4: memref<288x256xf32, #tpu.memory_space<vmem>>, %arg5: memref<32x288xf32, #tpu.memory_space<vmem>>, %arg6: memref<32x256xf32, #tpu.memory_space<vmem>>, %arg7: memref<6x64xf32, #tpu.memory_space<vmem>>, %arg8: memref<3x1xf32, #tpu.memory_space<vmem>>, %arg9: memref<2x32x256xf32, #tpu.memory_space<vmem>>, %arg10: memref<2x3x256xf32, #tpu.memory_space<vmem>>) attributes {dimension_semantics = [#tpu.dimension_semantics<parallel>], iteration_bounds = array<i64: 1>, scalar_prefetch = 0 : i64, scratch_operands = 0 : i64, tpu.core_type = #tpu.core_type<tc>, window_params = [{transform_indices = @transform_0, window_bounds = array<i64: 2, 288>}, {transform_indices = @transform_1, window_bounds = array<i64: 2, 32, 1>}, {transform_indices = @transform_2, window_bounds = array<i64: 2, 32, 1>}, {pipeline_mode = #tpu.pipeline_mode<synchronous>, transform_indices = @transform_3, window_bounds = array<i64: 288, 256>}, {pipeline_mode = #tpu.pipeline_mode<synchronous>, transform_indices = @transform_4, window_bounds = array<i64: 32, 288>}, {pipeline_mode = #tpu.pipeline_mode<synchronous>, transform_indices = @transform_5, window_bounds = array<i64: 32, 256>}, {pipeline_mode = #tpu.pipeline_mode<synchronous>, transform_indices = @transform_6, window_bounds = array<i64: 6, 64>}, {pipeline_mode = #tpu.pipeline_mode<synchronous>, transform_indices = @transform_7, window_bounds = array<i64: 3, 1>}, {transform_indices = @transform_8, window_bounds = array<i64: 2, 32, 256>}, {transform_indices = @transform_9, window_bounds = array<i64: 2, 3, 256>}]} {
    %c0 = arith.constant 0 : index
    %c0_0 = arith.constant 0 : index
    %0 = vector.load %arg5[%c0, %c0_0] : memref<32x288xf32, #tpu.memory_space<vmem>>, vector<32x288xf32>
    %1 = vector.shape_cast %0 : vector<32x288xf32> to vector<1x32x288xf32>
    %c0_1 = arith.constant 0 : index
    %c0_2 = arith.constant 0 : index
    %2 = vector.load %arg1[%c0_1, %c0_2] : memref<2x288xf32, #tpu.memory_space<vmem>>, vector<2x288xf32>
    %3 = vector.shape_cast %2 : vector<2x288xf32> to vector<2x1x288xf32>
    %4 = vector.broadcast %1 : vector<1x32x288xf32> to vector<2x32x288xf32>
    %5 = vector.broadcast %3 : vector<2x1x288xf32> to vector<2x32x288xf32>
    %6 = arith.mulf %4, %5 : vector<2x32x288xf32>
    %7 = vector.shape_cast %6 : vector<2x32x288xf32> to vector<64x288xf32>
    %c0_3 = arith.constant 0 : index
    %c0_4 = arith.constant 0 : index
    %8 = vector.load %arg4[%c0_3, %c0_4] : memref<288x256xf32, #tpu.memory_space<vmem>>, vector<288x256xf32>
    %cst = arith.constant dense<0.000000e+00> : vector<64x256xf32>
    %9 = tpu.matmul %7, %8, %cst {dimension_numbers = #tpu.dot_dimension_numbers<[1], [0], [0], [1], [0, 0, 1, 1], [], []>} : vector<64x288xf32>, vector<288x256xf32>, vector<64x256xf32> -> vector<64x256xf32>
    %10 = vector.shape_cast %9 : vector<64x256xf32> to vector<2x32x256xf32>
    %c0_5 = arith.constant 0 : index
    %c0_6 = arith.constant 0 : index
    %c0_7 = arith.constant 0 : index
    %11 = vector.load %arg2[%c0_5, %c0_6, %c0_7] : memref<2x32x1xf32, #tpu.memory_space<vmem>>, vector<2x32x1xf32>
    %12 = vector.broadcast %11 : vector<2x32x1xf32> to vector<2x32x256xf32>
    %13 = arith.mulf %10, %12 : vector<2x32x256xf32>
    %c0_8 = arith.constant 0 : index
    %c0_9 = arith.constant 0 : index
    %14 = vector.load %arg6[%c0_8, %c0_9] : memref<32x256xf32, #tpu.memory_space<vmem>>, vector<32x256xf32>
    %15 = vector.shape_cast %14 : vector<32x256xf32> to vector<1x32x256xf32>
    %16 = vector.broadcast %15 : vector<1x32x256xf32> to vector<2x32x256xf32>
    %17 = arith.addf %13, %16 : vector<2x32x256xf32>
    %cst_10 = arith.constant 0.000000e+00 : f32
    %18 = vector.broadcast %cst_10 : f32 to vector<2x32x256xf32>
    %19 = arith.cmpf oge, %17, %18 : vector<2x32x256xf32>
    %cst_11 = arith.constant 2.000000e-01 : f32
    %20 = vector.broadcast %cst_11 : f32 to vector<2x32x256xf32>
    %21 = arith.mulf %20, %17 : vector<2x32x256xf32>
    %22 = arith.select %19, %17, %21 : vector<2x32x256xi1>, vector<2x32x256xf32>
    %cst_12 = arith.constant -2.560000e+02 : f32
    %cst_13 = arith.constant 2.560000e+02 : f32
    %23 = vector.broadcast %cst_12 : f32 to vector<2x32x256xf32>
    %24 = arith.maximumf %23, %22 : vector<2x32x256xf32>
    %25 = vector.broadcast %cst_13 : f32 to vector<2x32x256xf32>
    %26 = arith.minimumf %25, %24 : vector<2x32x256xf32>
    %c0_14 = arith.constant 0 : index
    %c0_15 = arith.constant 0 : index
    %c0_16 = arith.constant 0 : index
    %27 = vector.load %arg9[%c0_14, %c0_15, %c0_16] : memref<2x32x256xf32, #tpu.memory_space<vmem>>, vector<2x32x256xf32>
    tpu.vector_store %arg9[%c0_14, %c0_15, %c0_16], %26 {strides = array<i32>} : memref<2x32x256xf32, #tpu.memory_space<vmem>>, vector<2x32x256xf32>,
    %c0_17 = arith.constant 0 : index
    %c0_18 = arith.constant 0 : index
    %c0_19 = arith.constant 0 : index
    %28 = vector.load %arg3[%c0_17, %c0_18, %c0_19] : memref<2x32x1xf32, #tpu.memory_space<vmem>>, vector<2x32x1xf32>
    %29 = vector.broadcast %28 : vector<2x32x1xf32> to vector<2x32x256xf32>
    %30 = arith.mulf %26, %29 : vector<2x32x256xf32>
    %31 = vector.shape_cast %30 : vector<2x32x256xf32> to vector<64x256xf32>
    %c0_20 = arith.constant 0 : index
    %c0_21 = arith.constant 0 : index
    %32 = vector.load %arg7[%c0_20, %c0_21] : memref<6x64xf32, #tpu.memory_space<vmem>>, vector<6x64xf32>
    %cst_22 = arith.constant dense<0.000000e+00> : vector<6x256xf32>
    %33 = tpu.matmul %32, %31, %cst_22 {dimension_numbers = #tpu.dot_dimension_numbers<[1], [0], [0], [1], [0, 0, 1, 1], [], []>} : vector<6x64xf32>, vector<64x256xf32>, vector<6x256xf32> -> vector<6x256xf32>
    %34 = vector.shape_cast %33 : vector<6x256xf32> to vector<2x3x256xf32>
    %c0_23 = arith.constant 0 : index
    %c0_24 = arith.constant 0 : index
    %35 = vector.load %arg8[%c0_23, %c0_24] : memref<3x1xf32, #tpu.memory_space<vmem>>, vector<3x1xf32>
    %36 = vector.shape_cast %35 : vector<3x1xf32> to vector<1x3x1xf32>
    %37 = vector.broadcast %36 : vector<1x3x1xf32> to vector<2x3x256xf32>
    %38 = arith.addf %34, %37 : vector<2x3x256xf32>
    %cst_25 = arith.constant -2.560000e+02 : f32
    %cst_26 = arith.constant 2.560000e+02 : f32
    %39 = vector.broadcast %cst_25 : f32 to vector<2x3x256xf32>
    %40 = arith.maximumf %39, %38 : vector<2x3x256xf32>
    %41 = vector.broadcast %cst_26 : f32 to vector<2x3x256xf32>
    %42 = arith.minimumf %41, %40 : vector<2x3x256xf32>
    %c0_27 = arith.constant 0 : index
    %c0_28 = arith.constant 0 : index
    %c0_29 = arith.constant 0 : index
    %43 = vector.load %arg10[%c0_27, %c0_28, %c0_29] : memref<2x3x256xf32, #tpu.memory_space<vmem>>, vector<2x3x256xf32>
    tpu.vector_store %arg10[%c0_27, %c0_28, %c0_29], %42 {strides = array<i32>} : memref<2x3x256xf32, #tpu.memory_space<vmem>>, vector<2x3x256xf32>,
    return
  }
  func.func @transform_0(%arg0: i32) -> (i32, i32) {
    %c0_i32 = arith.constant 0 : i32
    %c0_i32_0 = arith.constant 0 : i32
    return %arg0, %c0_i32 : i32, i32
  }
  func.func @transform_1(%arg0: i32) -> (i32, i32, i32) {
    %c0_i32 = arith.constant 0 : i32
    %c0_i32_0 = arith.constant 0 : i32
    %c0_i32_1 = arith.constant 0 : i32
    return %arg0, %c0_i32, %c0_i32_0 : i32, i32, i32
  }
  func.func @transform_2(%arg0: i32) -> (i32, i32, i32) {
    %c0_i32 = arith.constant 0 : i32
    %c0_i32_0 = arith.constant 0 : i32
    %c0_i32_1 = arith.constant 0 : i32
    return %arg0, %c0_i32, %c0_i32_0 : i32, i32, i32
  }
  func.func @transform_3(%arg0: i32) -> (i32, i32) {
    %c0_i32 = arith.constant 0 : i32
    %c0_i32_0 = arith.constant 0 : i32
    %c0_i32_1 = arith.constant 0 : i32
    return %c0_i32, %c0_i32_0 : i32, i32
  }
  func.func @transform_4(%arg0: i32) -> (i32, i32) {
    %c0_i32 = arith.constant 0 : i32
    %c0_i32_0 = arith.constant 0 : i32
    %c0_i32_1 = arith.constant 0 : i32
    return %c0_i32, %c0_i32_0 : i32, i32
  }
  func.func @transform_5(%arg0: i32) -> (i32, i32) {
    %c0_i32 = arith.constant 0 : i32
    %c0_i32_0 = arith.constant 0 : i32
    %c0_i32_1 = arith.constant 0 : i32
    return %c0_i32, %c0_i32_0 : i32, i32
  }
  func.func @transform_6(%arg0: i32) -> (i32, i32) {
    %c0_i32 = arith.constant 0 : i32
    %c0_i32_0 = arith.constant 0 : i32
    %c0_i32_1 = arith.constant 0 : i32
    return %c0_i32, %c0_i32_0 : i32, i32
  }
  func.func @transform_7(%arg0: i32) -> (i32, i32) {
    %c0_i32 = arith.constant 0 : i32
    %c0_i32_0 = arith.constant 0 : i32
    %c0_i32_1 = arith.constant 0 : i32
    return %c0_i32, %c0_i32_0 : i32, i32
  }
  func.func @transform_8(%arg0: i32) -> (i32, i32, i32) {
    %c0_i32 = arith.constant 0 : i32
    %c0_i32_0 = arith.constant 0 : i32
    %c0_i32_1 = arith.constant 0 : i32
    return %arg0, %c0_i32, %c0_i32_0 : i32, i32, i32
  }
  func.func @transform_9(%arg0: i32) -> (i32, i32, i32) {
    %c0_i32 = arith.constant 0 : i32
    %c0_i32_0 = arith.constant 0 : i32
    %c0_i32_1 = arith.constant 0 : i32
    return %arg0, %c0_i32, %c0_i32_0 : i32, i32, i32
  }
}

</mosaic_0001>

<bundles_post_ra>
// kernel: tpu_custom_call.1
= control target key start
LH: loop header
LB: loop body
LE: loop exit
PB: predicated region body
PF: predicated region fallthrough
CT: control target
= control target key end

     0   :  { %15 = vsyncpa [#allocation3], 0  ;;  %s1437_s0 = inlined_call_operand.vmem [shape: f32[2,288], index: 0, kind: input, shape index: {}]   ;;  %s1438_s1 = inlined_call_operand.vmem [shape: f32[2,32,1], index: 1, kind: input, shape index: {}]   ;;  %s1439_s2 = inlined_call_operand.vmem [shape: f32[2,32,1], index: 2, kind: input, shape index: {}]   ;;  %s1440_s3 = inlined_call_operand.hbm [shape: f32[288,256], index: 3, kind: input, shape index: {}]   ;;  %s1441_s4 = inlined_call_operand.vmem [shape: f32[32,288], index: 4, kind: input, shape index: {}]   ;;  %s1442_s5 = inlined_call_operand.hbm [shape: f32[32,256], index: 5, kind: input, shape index: {}]   ;;  %s1443_s6 = inlined_call_operand.vmem [shape: f32[6,64], index: 6, kind: input, shape index: {}]   ;;  %s1444_s7 = inlined_call_operand.vmem [shape: f32[3,1], index: 7, kind: input, shape index: {}]   ;;  %s1445_s8 = inlined_call_operand.hbm [shape: f32[2,32,256], index: 8, kind: output, shape index: {0}]   ;;  %s1446_s9 = inlined_call_operand.vmem [shape: f32[2,3,256], index: 9, kind: output, shape index: {1}]  }
   0x1   :  { %16 = vsyncpa [#allocation6], 0 }
   0x2   :  { %17 = vsyncpa [#allocation4], 0  ;;  %s1066_s30 = smov [#allocation2]  }
   0x3   :  { %s29_s10 = sshll.u32 %s1066_s30, 4  ;;  %s30_s10 = int_to_ptr.vmem [resolvable:$true] %s29_s10 }
   0x4   :  { %s1008_s11 = scalar_lea.vmem %s30_s10, 9216  ;;  %p1013_p1 = scmp.lt.s32.totalorder %s30_s10, %s30_s10 }
   0x5   :  { %p1009_p0 = scmp.ne.s32.totalorder %s30_s10, %s1008_s11  ;;  %p1014_p2 = scmp.lt.s32.totalorder %s1008_s11, %s1008_s11 }
   0x7   :  { %p1015_p3 = por %p1014_p2, %p1013_p1 }
   0x9   :  { %p1016_p4 = pnand %p1015_p3, %p1009_p0 }
   0xb   :  { %1019 = shalt.err (!%p1016_p4)
}
   0xc   :  { %s1067_s12 = smov 256   ;;  %s1068_s13 = smov 16  }
   0xd   :  { %35 = dma.hbm_to_vmem [thread:$0]  %s1440_s3, 9216, %s30_s10, [#allocation3], %s1067_s12, %s1067_s12, %s1068_s13  }
   0xe   :  { %s1069_s16 = smov [#allocation5]  }
   0xf   :  { %s43_s17 = sshll.u32 %s1069_s16, 4  ;;  %s44_s17 = int_to_ptr.vmem [resolvable:$true] %s43_s17 }
  0x10   :  { %s1028_s18 = scalar_lea.vmem %s44_s17, 1024  ;;  %p1033_p6 = scmp.lt.s32.totalorder %s44_s17, %s44_s17 }
  0x11   :  { %p1029_p5 = scmp.ne.s32.totalorder %s44_s17, %s1028_s18  ;;  %p1034_p7 = scmp.lt.s32.totalorder %s1028_s18, %s1028_s18 }
  0x13   :  { %p1035_p8 = por %p1034_p7, %p1033_p6 }
  0x15   :  { %p1036_p9 = pnand %p1035_p8, %p1029_p5 }
  0x17   :  { %1039 = shalt.err (!%p1036_p9)
}
  0x18   :  { %49 = dma.hbm_to_vmem [thread:$0]  %s1442_s5, 1024, %s44_s17, [#allocation6], %s1067_s12, %s1067_s12, %s1068_s13  }
  0x19   :  { %1060 = dma.done.wait [#allocation3], 9216  }
  0x1a   :  { %1061 = vsyncadd [#allocation3], 4294958080 }
  0x1b   :  { %1062 = dma.done.wait [#allocation6], 1024  }
  0x1c   :  { %1063 = vsyncadd [#allocation6], 4294966272  ;;  %v1070_v0 = vmov 0.0   ;;  %v1071_v1 = vmov 0   ;;  %v167_v2 = vld [vmem:[#allocation2 + $0xf8] sm:$0xff]  ;;  %v166_v3 = vld [vmem:[#allocation2 + $0xf0] sm:$0xff]  ;;  %v82_v18 = vlaneseq }
  0x1d   :  { %410 = vmatprep.mubr.f32.mxu1 %v1070_v0  ;;  %998 = vset.pattern.permute.xlu0 %v1071_v1  ;;  %v165_v4 = vld [vmem:[#allocation2 + $0xe8] sm:$0xff]  ;;  %v164_v5 = vld [vmem:[#allocation2 + $0xe0] sm:$0xff]  ;;  %v163_v6 = vld [vmem:[#allocation2 + $0xd8] sm:$0xff]  ;;  %vm208_vm0 = vcmask 261120  }
  0x1e   :  { %999 = vset.pattern.permute.xlu1 %v1071_v1  ;;  %233 = vmatprep.subr.mxu0 %v167_v2  ;;  %v162_v7 = vld [vmem:[#allocation2 + $0xd0] sm:$0xff]  ;;  %v161_v8 = vld [vmem:[#allocation2 + $0xc8] sm:$0xff]  ;;  %v160_v9 = vld [vmem:[#allocation2 + $0xc0] sm:$0xff]  ;;  %v1138_v23 = vshrl.u32 %v82_v18, 7 }
  0x1f   :  { %234 = vmatpush1.msra.mxu0 %v166_v3  ;;  %v159_v10 = vld [vmem:[#allocation2 + $0xb8] sm:$0xff]  ;;  %v158_v11 = vld [vmem:[#allocation2 + $0xb0] sm:$0xff]  ;;  %v157_v12 = vld [vmem:[#allocation2 + $0xa8] sm:$0xff] }
  0x20   :  { %235 = vmatprep.subr.mxu0 %v165_v4  ;;  %v156_v13 = vld [vmem:[#allocation2 + $0xa0] sm:$0xff]  ;;  %v155_v14 = vld [vmem:[#allocation2 + $0x98] sm:$0xff]  ;;  %v154_v15 = vld [vmem:[#allocation2 + $0x90] sm:$0xff]  ;;  %v1141_v34 = vsub.s32 2, %v1138_v23  ;;  %v1144_v35 = vsub.s32 1, %v1138_v23 }
  0x21   :  { %236 = vmatpush1.msra.mxu0 %v164_v5  ;;  %v153_v16 = vld [vmem:[#allocation2 + $0x88] sm:$0xff]  ;;  %v152_v17 = vld [vmem:[#allocation2 + $0x80] sm:$0xff]  ;;  %v151_v19 = vld [vmem:[#allocation2 + $0x78] sm:$0xff] }
  0x22   :  { %237 = vmatprep.subr.mxu0 %v163_v6  ;;  %v150_v20 = vld [vmem:[#allocation2 + $0x70] sm:$0xff]  ;;  %v149_v21 = vld [vmem:[#allocation2 + $0x68] sm:$0xff]  ;;  %v148_v22 = vld [vmem:[#allocation2 + $0x60] sm:$0xff] }
  0x23   :  { %238 = vmatpush1.msra.mxu0 %v162_v7  ;;  %v147_v24 = vld [vmem:[#allocation2 + $0x58] sm:$0xff]  ;;  %v146_v26 = vld [vmem:[#allocation2 + $0x50] sm:$0xff]  ;;  %v205_v28 = vld [vmem:[#allocation2 + $0x228] sm:$0xff] }
  0x24   :  { %239 = vmatprep.subr.mxu0 %v161_v8  ;;  %v207_v25 = vld [vmem:[#allocation2 + $0x238] sm:$0xff]  ;;  %v206_v27 = vld [vmem:[#allocation2 + $0x230] sm:$0xff]  ;;  %v145_v29 = vld [vmem:[#allocation2 + $0x48] sm:$0xff] }
  0x25   :  { %240 = vmatpush1.msra.mxu0 %v160_v9  ;;  %370 = vmatprep.subr.mxu1 %v207_v25  ;;  %v204_v30 = vld [vmem:[#allocation2 + $0x220] sm:$0xff]  ;;  %v203_v32 = vld [vmem:[#allocation2 + $0x218] sm:$0xff]  ;;  %v202_v33 = vld [vmem:[#allocation2 + $0x210] sm:$0xff] }
  0x26   :  { %241 = vmatprep.subr.mxu0 %v159_v10  ;;  %371 = vmatpush1.msra.mxu1 %v206_v27  ;;  %v144_v31 = vld [vmem:[#allocation2 + $0x40] sm:$0xff]  ;;  %v143_v36 = vld [vmem:[#allocation2 + $0x38] sm:$0xff]  ;;  %v201_v37 = vld [vmem:[#allocation2 + $0x208] sm:$0xff] }
  0x27   :  { %242 = vmatpush1.msra.mxu0 %v158_v11  ;;  %372 = vmatprep.subr.mxu1 %v205_v28  ;;  %v142_v38 = vld [vmem:[#allocation2 + $0x30] sm:$0xff]  ;;  %v141_v39 = vld [vmem:[#allocation2 + $0x28] sm:$0xff]  ;;  %v200_v40 = vld [vmem:[#allocation2 + $0x200] sm:$0xff] }
  0x28   :  { %243 = vmatprep.subr.mxu0 %v157_v12  ;;  %373 = vmatpush1.msra.mxu1 %v204_v30  ;;  %v1149_v41 = vld [vmem:[%s1441_s4 + $0x10] sm:$0xff]  ;;  %v1154_v42 = vld.sshfl [vmem:[%s1437_s0] sm:$0x77 pattern:$0x75316420]  ;;  %v1159_v43 = vld [vmem:[%s1441_s4 + $0x8] sm:$0xff] }
  0x29   :  { %244 = vmatpush1.msra.mxu0 %v156_v13  ;;  %374 = vmatprep.subr.mxu1 %v203_v32  ;;  %v140_v44 = vld [vmem:[#allocation2 + $0x20] sm:$0xff]  ;;  %v93_v45 = vrot.slane %v1154_v42, %v1141_v34  ;;  %v1165_v46 = vrot.slane %v1154_v42, %v1144_v35  ;;  %v139_v47 = vld [vmem:[#allocation2 + $0x18] sm:$0xff]  ;;  %v1170_v48 = vld [vmem:[%s1441_s4 + $0x28] sm:$0xff]  ;;  %v1191_v62 = vcombine.high %v1154_v42, %v1154_v42 }
  0x2a   :  { %245 = vmatprep.subr.mxu0 %v155_v14  ;;  %375 = vmatpush1.msra.mxu1 %v202_v33  ;;  %v138_v49 = vld [vmem:[#allocation2 + $0x10] sm:$0xff]  ;;  %v137_v52 = vld [vmem:[#allocation2 + $0x8] sm:$0xff]  ;;  %v136_v53 = vld [vmem:[#allocation2] sm:$0xff] }
  0x2b   :  { %246 = vmatpush1.msra.mxu0 %v154_v15  ;;  %376 = vmatprep.subr.mxu1 %v201_v37  ;;  %v114_v50 = vmul.f32 %v93_v45, %v1149_v41  ;;  %v113_v51 = vmul.f32 %v1165_v46, %v1159_v43  ;;  %v117_v54 = vmul.f32 %v93_v45, %v1170_v48  ;;  %v466_v55 = vld [vmem:[%s1438_s1 + $0x38] sm:$0xff]  ;;  %v1183_v57 = vld [vmem:[%s1441_s4 + $0x40] sm:$0xff]  ;;  %v198_v58 = vld [vmem:[#allocation2 + $0x1f0] sm:$0xff] }
  0x2c   :  { %247 = vmatprep.subr.mxu0 %v153_v16  ;;  %377 = vmatpush1.msra.mxu1 %v200_v40  ;;  %v199_v56 = vld [vmem:[#allocation2 + $0x1f8] sm:$0xff]  ;;  %v197_v59 = vld [vmem:[#allocation2 + $0x1e8] sm:$0xff]  ;;  %v196_v61 = vld [vmem:[#allocation2 + $0x1e0] sm:$0xff]  ;;  %v120_v63 = vmul.f32 %v93_v45, %v1183_v57  ;;  %v105_v9 = vrot.slane %v1191_v62, %v1141_v34  ;;  %v1246_v40 = vsub.s32 0, %v1138_v23 }
  0x2d   :  { %248 = vmatpush1.msra.mxu0 %v152_v17  ;;  %956 = vmatmul.mubr.msk.f32.vlgmr.msra.gmra.mxu1 %vm208_vm0, %v114_v50  ;;  %v464_v60 = vld [vmem:[%s1438_s1 + $0x28] sm:$0xff]  ;;  %v465_v1 = vld [vmem:[%s1438_s1 + $0x30] sm:$0xff]  ;;  %v195_v2 = vld [vmem:[#allocation2 + $0x1d8] sm:$0xff] }
  0x2e   :  { %249 = vmatprep.subr.mxu0 %v151_v19  ;;  %297 = vmatprep.mubr.f32.mxu0 %v113_v51  ;;  %v1202_v3 = vld [vmem:[%s1441_s4 + $0x58] sm:$0xff]  ;;  %v194_v4 = vld [vmem:[#allocation2 + $0x1d0] sm:$0xff]  ;;  %v193_v5 = vld [vmem:[#allocation2 + $0x1c8] sm:$0xff]  ;;  %v126_v16 = vmul.f32 %v105_v9, %v1149_v41  ;;  %v85_v51 = vrot.slane %v1154_v42, %v1246_v40 }
  0x2f   :  { %250 = vmatpush1.msra.mxu0 %v150_v20  ;;  %416 = vmatprep.mubr.f32.mxu1 %v1070_v0  ;;  %v463_v6 = vld [vmem:[%s1438_s1 + $0x20] sm:$0xff]  ;;  %v123_v8 = vmul.f32 %v93_v45, %v1202_v3  ;;  %v462_v10 = vld [vmem:[%s1438_s1 + $0x18] sm:$0xff]  ;;  %v190_v12 = vld [vmem:[#allocation2 + $0x1b0] sm:$0xff]  ;;  %v135_v41 = vmul.f32 %v105_v9, %v1202_v3 }
  0x30   :  { %251 = vmatprep.subr.mxu0 %v149_v21  ;;  %504 = vperm.xlu0 %998, %v466_v55   ;;  %v192_v7 = vld [vmem:[#allocation2 + $0x1c0] sm:$0xff]  ;;  %v191_v11 = vld [vmem:[#allocation2 + $0x1b8] sm:$0xff]  ;;  %v189_v13 = vld [vmem:[#allocation2 + $0x1a8] sm:$0xff] }
  0x31   :  { %252 = vmatpush1.msra.mxu0 %v148_v22  ;;  %957 = vmatmul.mubr.msk.f32.gmra.mxu1 %vm208_vm0, %v117_v54  ;;  %v650_v14 = vld [vmem:[%s1439_s2 + $0x38] sm:$0xff]  ;;  %v188_v15 = vld [vmem:[#allocation2 + $0x1a0] sm:$0xff]  ;;  %v461_v17 = vld [vmem:[%s1438_s1 + $0x10] sm:$0xff] }
  0x32   :  { %253 = vmatprep.subr.mxu0 %v147_v24  ;;  %422 = vmatprep.mubr.f32.mxu1 %v1070_v0  ;;  %v187_v18 = vld [vmem:[#allocation2 + $0x198] sm:$0xff]  ;;  %v186_v19 = vld [vmem:[#allocation2 + $0x190] sm:$0xff]  ;;  %v185_v20 = vld [vmem:[#allocation2 + $0x188] sm:$0xff]  ;;  %v129_v24 = vmul.f32 %v105_v9, %v1170_v48 }
  0x33   :  { %254 = vmatpush1.msra.mxu0 %v146_v26  ;;  %494 = vperm.xlu1 %999, %v464_v60   ;;  %v649_v21 = vld [vmem:[%s1439_s2 + $0x30] sm:$0xff]  ;;  %v184_v22 = vld [vmem:[#allocation2 + $0x180] sm:$0xff]  ;;  %v460_v25 = vld [vmem:[%s1438_s1 + $0x8] sm:$0xff] }
  0x34   :  { %255 = vmatprep.subr.mxu0 %v145_v29  ;;  %499 = vperm.xlu0 %998, %v465_v1   ;;  %v183_v26 = vld [vmem:[#allocation2 + $0x178] sm:$0xff]  ;;  %v182_v27 = vld [vmem:[#allocation2 + $0x170] sm:$0xff]  ;;  %v181_v28 = vld [vmem:[#allocation2 + $0x168] sm:$0xff] }
  0x35   :  { %256 = vmatpush1.msra.mxu0 %v144_v31  ;;  %958 = vmatmul.mubr.msk.f32.gmra.mxu1 %vm208_vm0, %v120_v63  ;;  %v648_v29 = vld [vmem:[%s1439_s2 + $0x28] sm:$0xff]  ;;  %v180_v30 = vld [vmem:[#allocation2 + $0x160] sm:$0xff]  ;;  %v132_v31 = vmul.f32 %v105_v9, %v1183_v57  ;;  %v179_v33 = vld [vmem:[#allocation2 + $0x158] sm:$0xff] }
  0x36   :  { %257 = vmatprep.subr.mxu0 %v143_v36  ;;  %428 = vmatprep.mubr.f32.mxu1 %v1070_v0  ;;  %v459_v32 = vld [vmem:[%s1438_s1] sm:$0xff]  ;;  %v178_v36 = vld [vmem:[#allocation2 + $0x150] sm:$0xff]  ;;  %v177_v37 = vld [vmem:[#allocation2 + $0x148] sm:$0xff]  ;;  %s1072_s1 = smov [#allocation7]  }
  0x37   :  { %258 = vmatpush1.msra.mxu0 %v142_v38  ;;  %489 = vperm.xlu1 %999, %v463_v6   ;;  %v647_v38 = vld [vmem:[%s1439_s2 + $0x20] sm:$0xff]  ;;  %v175_v45 = vld [vmem:[#allocation2 + $0x138] sm:$0xff]  ;;  %v173_v48 = vld [vmem:[#allocation2 + $0x128] sm:$0xff]  ;;  %v101_v6 = vrot.slane %v1191_v62, %v1144_v35  ;;  %s938_s11 = sshll.u32 %s1072_s1, 4  ;;  %s939_s11 = int_to_ptr.vmem [resolvable:$true] %s938_s11 }
  0x38   :  { %259 = vmatprep.subr.mxu0 %v141_v39  ;;  %484 = vperm.xlu0 %998, %v462_v10   ;;  %v176_v39 = vld [vmem:[#allocation2 + $0x140] sm:$0xff]  ;;  %v170_v55 = vld [vmem:[#allocation2 + $0x110] sm:$0xff]  ;;  %v67_v63 = vld [vmem:[%s1441_s4 + $0x38] sm:$0xff]  ;;  %v97_v10 = vrot.slane %v1191_v62, %v1246_v40  ;;  %s1040_s14 = scalar_lea.vmem %s939_s11, 2048  ;;  %p1045_p11 = scmp.lt.s32.totalorder %s939_s11, %s939_s11 }
  0x39   :  { %260 = vmatpush1.msra.mxu0 %v140_v44  ;;  %959 = vmatmul.mubr.msk.f32.gmra.mxu1 %vm208_vm0, %v123_v8  ;;  %v646_v44 = vld [vmem:[%s1439_s2 + $0x18] sm:$0xff]  ;;  %v172_v50 = vld [vmem:[#allocation2 + $0x120] sm:$0xff]  ;;  %v66_v3 = vld [vmem:[%s1441_s4 + $0x30] sm:$0xff]  ;;  %p1041_p10 = scmp.ne.s32.totalorder %s939_s11, %s1040_s14  ;;  %p1046_p12 = scmp.lt.s32.totalorder %s1040_s14, %s1040_s14 }
  0x3a   :  { %261 = vmatprep.subr.mxu0 %v139_v47  ;;  %434 = vmatprep.mubr.f32.mxu1 %v1070_v0  ;;  %v174_v47 = vld [vmem:[#allocation2 + $0x130] sm:$0xff]  ;;  %v60_v54 = vld [vmem:[%s1441_s4] sm:$0xff]  ;;  %v69_v8 = vld [vmem:[%s1441_s4 + $0x48] sm:$0xff] }
  0x3b   :  { %262 = vmatpush1.msra.mxu0 %v138_v49  ;;  %688 = vperm.xlu1 %999, %v650_v14   ;;  %v645_v49 = vld [vmem:[%s1439_s2 + $0x10] sm:$0xff]  ;;  %v64_v42 = vld [vmem:[%s1441_s4 + $0x20] sm:$0xff]  ;;  %v121_v9 = vmul.f32 %v85_v51, %v69_v8  ;;  %p1047_p13 = por %p1046_p12, %p1045_p11 }
  0x3c   :  { %263 = vmatprep.subr.mxu0 %v137_v52  ;;  %479 = vperm.xlu0 %998, %v461_v17   ;;  %v644_v52 = vld [vmem:[%s1439_s2 + $0x8] sm:$0xff]  ;;  %v643_v57 = vld [vmem:[%s1439_s2] sm:$0xff]  ;;  %v116_v60 = vmul.f32 %v1165_v46, %v64_v42  ;;  %v133_v17 = vmul.f32 %v97_v10, %v69_v8 }
  0x3d   :  { %264 = vmatpush1.msra.mxu0 %v136_v53  ;;  %960 = vmatmul.mubr.msk.f32.gmra.mxu1 %vm208_vm0, %v126_v16  ;;  %v171_v53 = vld [vmem:[#allocation2 + $0x118] sm:$0xff]  ;;  %p1048_p0 = pnand %p1047_p13, %p1041_p10 }
  0x3e   :  { %265 = vmatprep.subr.mxu0 %v199_v56  ;;  %440 = vmatprep.mubr.f32.mxu1 %v1070_v0  ;;  %v169_v56 = vld [vmem:[#allocation2 + $0x108] sm:$0xff] }
  0x3f   :  { %266 = vmatpush2.msra.mxu0 %v198_v58  ;;  %683 = vperm.xlu1 %999, %v649_v21   ;;  %v168_v58 = vld [vmem:[#allocation2 + $0x100] sm:$0xff] }
  0x40   :  { %267 = vmatprep.subr.mxu0 %v197_v59  ;;  %474 = vperm.xlu0 %998, %v460_v25   ;;  %v112_v59 = vmul.f32 %v85_v51, %v60_v54 }
  0x41   :  { %268 = vmatpush2.msra.mxu0 %v196_v61  ;;  %961 = vmatmul.mubr.msk.f32.gmra.mxu1 %vm208_vm0, %v129_v24  ;;  %v63_v61 = vld [vmem:[%s1441_s4 + $0x18] sm:$0xff] }
  0x42   :  { %269 = vmatprep.subr.mxu0 %v195_v2  ;;  %446 = vmatprep.mubr.f32.mxu1 %v1070_v0  ;;  %v115_v1 = vmul.f32 %v85_v51, %v63_v61  ;;  %v119_v2 = vmul.f32 %v1165_v46, %v67_v63  ;;  %v127_v14 = vmul.f32 %v97_v10, %v63_v61 }
  0x43   :  { %270 = vmatpush2.msra.mxu0 %v194_v4  ;;  %678 = vperm.xlu1 %999, %v648_v29   ;;  %v70_v4 = vld [vmem:[%s1441_s4 + $0x50] sm:$0xff] }
  0x44   :  { %271 = vmatprep.subr.mxu0 %v193_v5  ;;  %469 = vperm.xlu0 %998, %v459_v32   ;;  %v118_v5 = vmul.f32 %v85_v51, %v66_v3  ;;  %v134_v16 = vmul.f32 %v101_v6, %v70_v4 }
  0x45   :  { %272 = vmatpush2.msra.mxu0 %v192_v7  ;;  %962 = vmatmul.mubr.msk.f32.gmra.mxu1 %vm208_vm0, %v132_v31  ;;  %v122_v7 = vmul.f32 %v1165_v46, %v70_v4  ;;  %v131_v46 = vmul.f32 %v101_v6, %v67_v63 }
  0x46   :  { %273 = vmatprep.subr.mxu0 %v191_v11  ;;  %452 = vmatprep.mubr.f32.mxu1 %v1070_v0  ;;  %v125_v11 = vmul.f32 %v101_v6, %v1159_v43 }
  0x47   :  { %274 = vmatpush2.msra.mxu0 %v190_v12  ;;  %673 = vperm.xlu1 %999, %v647_v38   ;;  %v124_v12 = vmul.f32 %v97_v10, %v60_v54 }
  0x48   :  { %275 = vmatprep.subr.mxu0 %v189_v13  ;;  %668 = vperm.xlu0 %998, %v646_v44   ;;  %v128_v13 = vmul.f32 %v101_v6, %v64_v42 }
  0x49   :  { %276 = vmatpush2.msra.mxu0 %v188_v15  ;;  %963 = vmatmul.mubr.msk.f32.gmra.mxu1 %vm208_vm0, %v135_v41  ;;  %v130_v15 = vmul.f32 %v97_v10, %v66_v3  ;;  %v1307_v41 = vld [vmem:[#allocation5 + $0x8] sm:$0xff] }
  0x4a   :  { %277 = vmatprep.subr.mxu0 %v187_v18  ;;  %776 = vmatprep.mubr.f32.mxu1 %v1070_v0  ;;  %v839_v0 = vld [vmem:[%s1444_s7] sm:$0x7] }
  0x4b   :  { %278 = vmatpush2.msra.mxu0 %v186_v19  ;;  %663 = vperm.xlu1 %999, %v645_v49   ;;  %v1310_v49 = vld [vmem:[#allocation5 + $0x10] sm:$0xff] }
  0x4c   :  { %279 = vmatprep.subr.mxu0 %v185_v20  ;;  %658 = vperm.xlu0 %998, %v644_v52  }
  0x4d   :  { %280 = vmatpush2.msra.mxu0 %v184_v22 }
  0x4e   :  { %281 = vmatprep.subr.mxu0 %v183_v26 }
  0x4f   :  { %282 = vmatpush2.msra.mxu0 %v182_v27  ;;  %653 = vperm.xlu1 %999, %v643_v57  }
  0x50   :  { %283 = vmatprep.subr.mxu0 %v181_v28  ;;  %842 = vperm.xlu0 %998, %v839_v0   ;;  %v1316_v0 = vld [vmem:[#allocation5 + $0x20] sm:$0xff] }
  0x51   :  { %284 = vmatpush2.msra.mxu0 %v180_v30 }
  0x52   :  { %285 = vmatprep.subr.mxu0 %v179_v33  ;;  %v1305_v33 = vld [vmem:[#allocation5] sm:$0xff] }
  0x53   :  { %286 = vmatpush2.msra.mxu0 %v178_v36 }
  0x54   :  { %287 = vmatprep.subr.mxu0 %v177_v37 }
  0x55   :  { %288 = vmatpush2.msra.mxu0 %v176_v39 }
  0x56   :  { %289 = vmatprep.subr.mxu0 %v175_v45 }
  0x57   :  { %290 = vmatpush2.msra.mxu0 %v174_v47 }
  0x58   :  { %291 = vmatprep.subr.mxu0 %v173_v48 }
  0x59   :  { %292 = vmatpush2.msra.mxu0 %v172_v50 }
  0x5a   :  { %293 = vmatprep.subr.mxu0 %v171_v53 }
  0x5b   :  { %294 = vmatpush2.msra.mxu0 %v170_v55  ;;  %v1313_v55 = vld [vmem:[#allocation5 + $0x18] sm:$0xff] }
  0x5c   :  { %295 = vmatprep.subr.mxu0 %v169_v56 }
  0x5d   :  { %296 = vmatpush2.msra.mxu0 %v168_v58 }
  0x5e   :  { %298 = vmatmul.mubr.f32.vlgmr.msra.gmra.mxu0 %v112_v59 }
  0x5f   :  { %303 = vmatprep.mubr.f32.mxu0 %v116_v60 }
  0x62   :  { %304 = vmatmul.mubr.f32.gmra.mxu0 %v115_v1 }
  0x63   :  { %309 = vmatprep.mubr.f32.mxu0 %v119_v2 }
  0x66   :  { %310 = vmatmul.mubr.f32.gmra.mxu0 %v118_v5 }
  0x67   :  { %315 = vmatprep.mubr.f32.mxu0 %v122_v7  ;;  %v1324_v7 = vld [vmem:[#allocation5 + $0x28] sm:$0xff] }
  0x6a   :  { %316 = vmatmul.mubr.f32.gmra.mxu0 %v121_v9 }
  0x6b   :  { %321 = vmatprep.mubr.f32.mxu0 %v125_v11 }
  0x6e   :  { %322 = vmatmul.mubr.f32.gmra.mxu0 %v124_v12 }
  0x6f   :  { %327 = vmatprep.mubr.f32.mxu0 %v128_v13 }
  0x72   :  { %328 = vmatmul.mubr.f32.gmra.mxu0 %v127_v14 }
  0x73   :  { %333 = vmatprep.mubr.f32.mxu0 %v131_v46 }
  0x76   :  { %334 = vmatmul.mubr.f32.gmra.mxu0 %v130_v15 }
  0x77   :  { %339 = vmatprep.mubr.f32.mxu0 %v134_v16 }
  0x7a   :  { %340 = vmatmul.mubr.f32.gmra.mxu0 %v133_v17 }
  0xab   :  { %v1299_v62 = vpop.permute.xlu0 %504 }
  0xae   :  { %v1322_v6 = vpop.permute.xlu1 %494 }
  0xaf   :  { %v1301_v19 = vpop.permute.xlu0 %499 }
  0xb3   :  { %v1303_v21 = vpop.permute.xlu0 %484 }
  0xb7   :  { %v480_v25 = vpop.permute.xlu0 %479 }
  0xbb   :  { %v475_v27 = vpop.permute.xlu0 %474 }
  0xbf   :  { %v470_v31 = vpop.permute.xlu0 %469 }
  0xed   :  { %v412_v43 = vpop.f32.mrf.mxu1 }
  0xef   :  { %v414_v18 = vpop.f32.mrf.mxu1 }
  0xf1   :  { %v418_v20 = vpop.f32.mrf.mxu1 }
  0xf3   :  { %v420_v22 = vpop.f32.mrf.mxu1 }
  0xf5   :  { %v424_v24 = vpop.f32.mrf.mxu1 }
  0xf7   :  { %v426_v26 = vpop.f32.mrf.mxu1 }
  0xf9   :  { %v430_v28 = vpop.f32.mrf.mxu1 }
  0xfb   :  { %v432_v29 = vpop.f32.mrf.mxu1 }
  0xfd   :  { %v436_v39 = vpop.f32.mrf.mxu1 }
  0xff   :  { %v438_v54 = vpop.f32.mrf.mxu1 }
 0x101   :  { %v442_v5 = vpop.f32.mrf.mxu1 }
 0x11e   :  { %v299_v30 = vpop.f32.mrf.mxu0 }
 0x11f   :  { %v413_v32 = vadd.f32 %v412_v43, %v299_v30 }
 0x120   :  { %v301_v36 = vpop.f32.mrf.mxu0 }
 0x121   :  { %v507_v37 = vmul.f32 %v470_v31, %v413_v32  ;;  %v415_v38 = vadd.f32 %v414_v18, %v301_v36  ;;  %v1337_v18 = vld [vmem:[#allocation5 + $0x30] sm:$0xff] }
 0x122   :  { %v305_v44 = vpop.f32.mrf.mxu0 }
 0x123   :  { %v531_v45 = vadd.f32 %v1305_v33, %v507_v37  ;;  %v508_v47 = vmul.f32 %v470_v31, %v415_v38  ;;  %v419_v48 = vadd.f32 %v418_v20, %v305_v44  ;;  %v444_v20 = vpop.f32.mrf.mxu1  ;;  %v1345_v31 = vld [vmem:[#allocation5 + $0x38] sm:$0xff]  ;;  %v490_v37 = vpop.permute.xlu1 %489 }
 0x124   :  { %v307_v50 = vpop.f32.mrf.mxu0 }
 0x125   :  { %v532_v51 = vadd.f32 %v1307_v41, %v508_v47  ;;  %v509_v52 = vmul.f32 %v475_v27, %v419_v48  ;;  %v421_v53 = vadd.f32 %v420_v22, %v307_v50  ;;  %vm547_vm1 = vcmp.ge.f32.partialorder %v531_v45, 0.0  ;;  %v448_v50 = vpop.f32.mrf.mxu1 }
 0x126   :  { %v311_v42 = vpop.f32.mrf.mxu0  ;;  %v563_v56 = vmul.f32 0.2, %v531_v45 }
 0x127   :  { %v533_v57 = vadd.f32 %v1310_v49, %v509_v52  ;;  %v510_v58 = vmul.f32 %v475_v27, %v421_v53  ;;  %v425_v59 = vadd.f32 %v424_v24, %v311_v42  ;;  %vm548_vm2 = vcmp.ge.f32.partialorder %v532_v51, 0.0 }
 0x128   :  { %v313_v60 = vpop.f32.mrf.mxu0  ;;  %v564_v61 = vmul.f32 0.2, %v532_v51  ;;  %v1318_v63 = vsel %vm547_vm1, %v531_v45, %v563_v56  ;;  %vm708_vm1 = vcmask 523264  }
 0x129   :  { %v534_v1 = vadd.f32 %v1313_v55, %v510_v58  ;;  %v511_v2 = vmul.f32 %v480_v25, %v425_v59  ;;  %v427_v3 = vadd.f32 %v426_v26, %v313_v60  ;;  %v964_v4 = vclamps-f32 %v1318_v63, 256.0 }
 0x12a   :  { %v1326_v8 = vsel %vm548_vm2, %v532_v51, %v564_v61  ;;  %v317_v9 = vpop.f32.mrf.mxu0  ;;  %vm549_vm3 = vcmp.ge.f32.partialorder %v533_v57, 0.0  ;;  %v565_v10 = vmul.f32 0.2, %v533_v57 }
 0x12b   :  { %v535_v11 = vadd.f32 %v1316_v0, %v511_v2  ;;  %v512_v12 = vmul.f32 %v480_v25, %v427_v3  ;;  %v965_v13 = vclamps-f32 %v1326_v8, 256.0  ;;  %627 = vst [vmem:[#allocation7] sm:$0xff] %v964_v4  ;;  %v431_v14 = vadd.f32 %v430_v28, %v317_v9  ;;  %v450_v2 = vpop.f32.mrf.mxu1 }
 0x12c   :  { %v319_v46 = vpop.f32.mrf.mxu0  ;;  %vm550_vm4 = vcmp.ge.f32.partialorder %v534_v1, 0.0  ;;  %v566_v15 = vmul.f32 0.2, %v534_v1  ;;  %v1332_v16 = vsel %vm549_vm3, %v533_v57, %v565_v10  ;;  %v1371_v10 = vpop.permute.xlu1 %688 }
 0x12d   :  { %vm551_vm5 = vcmp.ge.f32.partialorder %v535_v11, 0.0  ;;  %v567_v17 = vmul.f32 0.2, %v535_v11  ;;  %v536_v43 = vadd.f32 %v1324_v7, %v512_v12  ;;  %628 = vst [vmem:[#allocation7 + $0x8] sm:$0xff] %v965_v13  ;;  %v513_v22 = vmul.f32 %v1303_v21, %v431_v14 }
 0x12e   :  { %v433_v24 = vadd.f32 %v432_v29, %v319_v46  ;;  %v1340_v25 = vsel %vm550_vm4, %v534_v1, %v566_v15  ;;  %v966_v26 = vclamps-f32 %v1332_v16, 256.0  ;;  %v323_v27 = vpop.f32.mrf.mxu0 }
 0x12f   :  { %v1343_v28 = vsel %vm551_vm5, %v535_v11, %v567_v17  ;;  %v568_v30 = vmul.f32 0.2, %v536_v43  ;;  %v967_v32 = vclamps-f32 %v1340_v25, 256.0  ;;  %v437_v36 = vadd.f32 %v436_v39, %v323_v27 }
 0x130   :  { %v968_v38 = vclamps-f32 %v1343_v28, 256.0  ;;  %v537_v44 = vadd.f32 %v1337_v18, %v513_v22  ;;  %v514_v29 = vmul.f32 %v1303_v21, %v433_v24  ;;  %629 = vst [vmem:[#allocation7 + $0x10] sm:$0xff] %v966_v26  ;;  %v325_v45 = vpop.f32.mrf.mxu0  ;;  %vm552_vm6 = vcmp.ge.f32.partialorder %v536_v43, 0.0  ;;  %v454_v24 = vpop.f32.mrf.mxu1  ;;  %v707_v28 = vld [vmem:[%s1443_s6] sm:$0x3f] }
 0x131   :  { %630 = vst [vmem:[#allocation7 + $0x18] sm:$0xff] %v967_v32  ;;  %v515_v47 = vmul.f32 %v490_v37, %v437_v36  ;;  %v439_v48 = vadd.f32 %v438_v54, %v325_v45  ;;  %v1358_v21 = vsel %vm552_vm6, %v536_v43, %v568_v30 }
 0x132   :  { %631 = vst [vmem:[#allocation7 + $0x20] sm:$0xff] %v968_v38  ;;  %vm553_vm7 = vcmp.ge.f32.partialorder %v537_v44, 0.0  ;;  %v569_v39 = vmul.f32 0.2, %v537_v44  ;;  %v538_v51 = vadd.f32 %v1345_v31, %v514_v29  ;;  %v329_v52 = vpop.f32.mrf.mxu0  ;;  %v969_v57 = vclamps-f32 %v1358_v21, 256.0 }
 0x133   :  { %v539_v53 = vadd.f32 %v1305_v33, %v515_v47  ;;  %v516_v42 = vmul.f32 %v490_v37, %v439_v48  ;;  %v443_v56 = vadd.f32 %v442_v5, %v329_v52  ;;  %v456_v52 = vpop.f32.mrf.mxu1 }
 0x134   :  { %v1362_v58 = vsel %vm553_vm7, %v537_v44, %v569_v39  ;;  %v570_v54 = vmul.f32 0.2, %v538_v51  ;;  %v331_v59 = vpop.f32.mrf.mxu0  ;;  %vm554_vm8 = vcmp.ge.f32.partialorder %v538_v51, 0.0  ;;  %632 = vst [vmem:[#allocation7 + $0x28] sm:$0xff] %v969_v57 }
 0x135   :  { %v970_v60 = vclamps-f32 %v1362_v58, 256.0  ;;  %vm555_vm9 = vcmp.ge.f32.partialorder %v539_v53, 0.0  ;;  %v571_v61 = vmul.f32 0.2, %v539_v53  ;;  %v540_v1 = vadd.f32 %v1307_v41, %v516_v42 }
 0x136   :  { %v517_v33 = vmul.f32 %v1322_v6, %v443_v56  ;;  %v445_v3 = vadd.f32 %v444_v20, %v331_v59  ;;  %v335_v5 = vpop.f32.mrf.mxu0  ;;  %v1369_v9 = vsel %vm554_vm8, %v538_v51, %v570_v54 }
 0x137   :  { %633 = vst [vmem:[#allocation7 + $0x30] sm:$0xff] %v970_v60  ;;  %v1375_v11 = vsel %vm555_vm9, %v539_v53, %v571_v61  ;;  %v572_v12 = vmul.f32 0.2, %v540_v1  ;;  %v449_v14 = vadd.f32 %v448_v50, %v335_v5  ;;  %vm556_vm10 = vcmp.ge.f32.partialorder %v540_v1, 0.0  ;;  %v684_v50 = vpop.permute.xlu1 %683 }
 0x138   :  { %v972_v41 = vclamps-f32 %v1375_v11, 256.0  ;;  %v541_v46 = vadd.f32 %v1310_v49, %v517_v33  ;;  %v518_v15 = vmul.f32 %v1322_v6, %v445_v3  ;;  %v337_v17 = vpop.f32.mrf.mxu0  ;;  %v971_v43 = vclamps-f32 %v1369_v9, 256.0 }
 0x139   :  { %v519_v20 = vmul.f32 %v1301_v19, %v449_v14  ;;  %v451_v22 = vadd.f32 %v450_v2, %v337_v17  ;;  %v1382_v27 = vsel %vm556_vm10, %v540_v1, %v572_v12 }
 0x13a   :  { %635 = vst [vmem:[#allocation7 + $0x40] sm:$0xff] %v972_v41  ;;  %vm557_vm11 = vcmp.ge.f32.partialorder %v541_v46, 0.0  ;;  %v573_v30 = vmul.f32 0.2, %v541_v46  ;;  %v542_v36 = vadd.f32 %v1313_v55, %v518_v15  ;;  %v341_v37 = vpop.f32.mrf.mxu0  ;;  %v973_v49 = vclamps-f32 %v1382_v27, 256.0  ;;  %634 = vst [vmem:[#allocation7 + $0x38] sm:$0xff] %v971_v43 }
 0x13b   :  { %v543_v6 = vadd.f32 %v1316_v0, %v519_v20  ;;  %v520_v44 = vmul.f32 %v1301_v19, %v451_v22  ;;  %v455_v29 = vadd.f32 %v454_v24, %v341_v37  ;;  %v679_v5 = vpop.permute.xlu1 %678  ;;  %v669_v24 = vpop.permute.xlu0 %668 }
 0x13c   :  { %v589_v45 = vsel %vm557_vm11, %v541_v46, %v573_v30  ;;  %v574_v47 = vmul.f32 0.2, %v542_v36  ;;  %v343_v48 = vpop.f32.mrf.mxu0  ;;  %vm558_vm12 = vcmp.ge.f32.partialorder %v542_v36, 0.0  ;;  %636 = vst [vmem:[#allocation7 + $0x48] sm:$0xff] %v973_v49 }
 0x13d   :  { %v974_v39 = vclamps-f32 %v589_v45, 256.0  ;;  %vm559_vm13 = vcmp.ge.f32.partialorder %v543_v6, 0.0  ;;  %v575_v55 = vmul.f32 0.2, %v543_v6  ;;  %v544_v51 = vadd.f32 %v1324_v7, %v520_v44 }
 0x13e   :  { %v521_v53 = vmul.f32 %v1299_v62, %v455_v29  ;;  %v457_v42 = vadd.f32 %v456_v52, %v343_v48  ;;  %v590_v56 = vsel %vm558_vm12, %v542_v36, %v574_v47  ;;  %v697_v44 = vmul.f32 %v970_v60, %v669_v24 }
 0x13f   :  { %637 = vst [vmem:[#allocation7 + $0x50] sm:$0xff] %v974_v39  ;;  %v591_v0 = vsel %vm559_vm13, %v543_v6, %v575_v55  ;;  %v576_v19 = vmul.f32 0.2, %v544_v51  ;;  %vm560_vm14 = vcmp.ge.f32.partialorder %v544_v51, 0.0  ;;  %v975_v54 = vclamps-f32 %v590_v56, 256.0  ;;  %v659_v29 = vpop.permute.xlu0 %658 }
 0x140   :  { %v976_v59 = vclamps-f32 %v591_v0, 256.0  ;;  %v545_v61 = vadd.f32 %v1337_v18, %v521_v53  ;;  %v522_v1 = vmul.f32 %v1299_v62, %v457_v42  ;;  %v674_v18 = vpop.permute.xlu1 %673  ;;  %v701_v30 = vmul.f32 %v974_v39, %v679_v5 }
 0x141   :  { %v592_v2 = vsel %vm560_vm14, %v544_v51, %v576_v19  ;;  %638 = vst [vmem:[#allocation7 + $0x58] sm:$0xff] %v975_v54  ;;  %v702_v27 = vmul.f32 %v975_v54, %v679_v5  ;;  %v700_v37 = vmul.f32 %v973_v49, %v674_v18  ;;  %v699_v6 = vmul.f32 %v972_v41, %v674_v18 }
 0x142   :  { %639 = vst [vmem:[#allocation7 + $0x60] sm:$0xff] %v976_v59  ;;  %vm561_vm15 = vcmp.ge.f32.partialorder %v545_v61, 0.0  ;;  %v577_v7 = vmul.f32 0.2, %v545_v61  ;;  %v546_v33 = vadd.f32 %v1345_v31, %v522_v1  ;;  %v977_v3 = vclamps-f32 %v592_v2, 256.0 }
 0x143   :  { %v703_v31 = vmul.f32 %v976_v59, %v684_v50  ;;  %v694_v11 = vmul.f32 %v967_v32, %v659_v29  ;;  %v693_v9 = vmul.f32 %v966_v26, %v659_v29 }
 0x144   :  { %v593_v12 = vsel %vm561_vm15, %v545_v61, %v577_v7  ;;  %v578_v14 = vmul.f32 0.2, %v546_v33  ;;  %vm562_vm0 = vcmp.ge.f32.partialorder %v546_v33, 0.0  ;;  %640 = vst [vmem:[#allocation7 + $0x68] sm:$0xff] %v977_v3  ;;  %v704_v22 = vmul.f32 %v977_v3, %v684_v50  ;;  %v664_v36 = vpop.permute.xlu1 %663 }
 0x145   :  { %v978_v46 = vclamps-f32 %v593_v12, 256.0  ;;  %v696_v45 = vmul.f32 %v969_v57, %v664_v36  ;;  %v695_v49 = vmul.f32 %v968_v38, %v664_v36 }
 0x146   :  { %v594_v15 = vsel %vm562_vm0, %v546_v33, %v578_v14 }
 0x147   :  { %641 = vst [vmem:[#allocation7 + $0x70] sm:$0xff] %v978_v46  ;;  %v979_v17 = vclamps-f32 %v594_v15, 256.0  ;;  %v705_v20 = vmul.f32 %v978_v46, %v1371_v10 }
 0x148   :  { %v654_v47 = vpop.permute.xlu1 %653 }
 0x149   :  { %642 = vst [vmem:[#allocation7 + $0x78] sm:$0xff] %v979_v17  ;;  %v706_v62 = vmul.f32 %v979_v17, %v1371_v10  ;;  %v698_v10 = vmul.f32 %v971_v43, %v669_v24  ;;  %v692_v58 = vmul.f32 %v965_v13, %v654_v47  ;;  %v691_v21 = vmul.f32 %v964_v4, %v654_v47 }
 0x14b   :  { %728 = vmatprep.subr.mxu1 %v706_v62 }
 0x14c   :  { %729 = vmatpush1.msra.mxu1 %v705_v20 }
 0x14d   :  { %730 = vmatprep.subr.mxu1 %v704_v22 }
 0x14e   :  { %731 = vmatpush1.msra.mxu1 %v703_v31 }
 0x14f   :  { %732 = vmatprep.subr.mxu1 %v702_v27 }
 0x150   :  { %733 = vmatpush1.msra.mxu1 %v701_v30 }
 0x151   :  { %734 = vmatprep.subr.mxu1 %v700_v37 }
 0x152   :  { %735 = vmatpush1.msra.mxu1 %v699_v6 }
 0x153   :  { %736 = vmatprep.subr.mxu1 %v698_v10 }
 0x154   :  { %737 = vmatpush1.msra.mxu1 %v697_v44 }
 0x155   :  { %738 = vmatprep.subr.mxu1 %v696_v45 }
 0x156   :  { %739 = vmatpush1.msra.mxu1 %v695_v49 }
 0x157   :  { %740 = vmatprep.subr.mxu1 %v694_v11 }
 0x158   :  { %741 = vmatpush1.msra.mxu1 %v693_v9 }
 0x159   :  { %742 = vmatprep.subr.mxu1 %v692_v58 }
 0x15a   :  { %743 = vmatpush1.msra.mxu1 %v691_v21 }
 0x15b   :  { %980 = vmatmul.mubr.msk.f32.vlgmr.msra.gmra.mxu1 %vm708_vm1, %v707_v28 }
 0x15c   :  { %1051 = shalt.err (!%p1048_p0)
}
 0x15d   :  { %944 = dma.vmem_to_hbm [thread:$0]  %s939_s11, 2048, %s1445_s8, [#allocation4], %s1067_s12, %s1067_s12, %s1068_s13   ;;  %v1073_v63 = vmov 1966171168   ;;  %v843_v26 = vpop.permute.xlu0 %842  ;;  %v1074_v43 = vmov 1935823168  }
 0x15e   :  { %v788_v4 = vunpack.c.l.s4 %v1073_v63  ;;  %v847_v41 = vrot.slane %v843_v26, %v1246_v40  ;;  %v885_v48 = vunpack.c.l.s4 %v1074_v43  ;;  %v851_v52 = vrot.slane %v843_v26, %v1144_v35 }
 0x15f   :  { %v855_v53 = vrot.slane %v843_v26, %v1141_v34 }
 0x160   :  { %v789_v8 = vunpack.c.0.s8 %v788_v4  ;;  %v886_v59 = vunpack.c.0.s8 %v885_v48 }
 0x162   :  { %v792_v16 = vsub.s32 %v789_v8, %v1138_v23  ;;  %v889_v12 = vsub.s32 %v886_v59, %v1138_v23 }
 0x21b   :  { %v778_v13 = vpop.f32.mrf.mxu1 }
 0x21d   :  { %v780_v25 = vpop.f32.mrf.mxu1 }
 0x21e   :  { %v785_v32 = vcombine.low %v778_v13, %v780_v25  ;;  %v786_v38 = vcombine.high %v778_v13, %v780_v25 }
 0x220   :  { %v793_v57 = vrot.slane %v785_v32, %v792_v16  ;;  %v800_v60 = vrot.slane %v786_v38, %v792_v16 }
 0x222   :  { %v801_v50 = vcombine.high %v793_v57, %v793_v57  ;;  %v802_v39 = vcombine.high %v800_v60, %v800_v60  ;;  %v809_v55 = vrot.slane %v793_v57, %v792_v16  ;;  %v816_v51 = vrot.slane %v800_v60, %v792_v16 }
 0x224   :  { %v823_v42 = vrot.slane %v801_v50, %v792_v16  ;;  %v830_v56 = vrot.slane %v802_v39, %v792_v16  ;;  %v831_v0 = vcombine.high %v809_v55, %v809_v55  ;;  %v859_v19 = vadd.f32 %v847_v41, %v809_v55 }
 0x225   :  { %v863_v54 = vadd.f32 %v851_v52, %v816_v51 }
 0x226   :  { %v832_v61 = vcombine.high %v823_v42, %v823_v42  ;;  %v860_v1 = vadd.f32 %v851_v52, %v823_v42  ;;  %v861_v2 = vadd.f32 %v855_v53, %v831_v0  ;;  %v864_v40 = vadd.f32 %v855_v53, %v830_v56 }
 0x227   :  { %v981_v33 = vclamps-f32 %v859_v19, 256.0  ;;  %v985_v35 = vclamps-f32 %v863_v54, 256.0 }
 0x228   :  { %v862_v7 = vadd.f32 %v847_v41, %v832_v61  ;;  %v982_v3 = vclamps-f32 %v860_v1, 256.0  ;;  %v983_v5 = vclamps-f32 %v861_v2, 256.0  ;;  %v986_v46 = vclamps-f32 %v864_v40, 256.0 }
 0x229   :  { %v920_v22 = vrot.slane %v985_v35, %v889_v12 }
 0x22a   :  { %v984_v14 = vclamps-f32 %v862_v7, 256.0  ;;  %v883_v34 = vcombine.low %v981_v33, %v983_v5  ;;  %v897_v17 = vrot.slane %v982_v3, %v889_v12 }
 0x22c   :  { %v890_v15 = vrot.slane %v883_v34, %v889_v12  ;;  %v906_v18 = vcombine.low %v984_v14, %v986_v46 }
 0x22e   :  { %v898_v62 = vcombine.low %v890_v15, %v897_v17  ;;  %v913_v20 = vrot.slane %v906_v18, %v889_v12 }
 0x230   :  { %v921_v31 = vcombine.low %v913_v20, %v920_v22  ;;  %987 = vst.sshfl [vmem:[%s1446_s9] sm:$0x5f pattern:$0x75316420] %v898_v62 }
 0x232   :  { %988 = vst.sshfl [vmem:[%s1446_s9 + $0x8] sm:$0x5f pattern:$0x75316420] %v921_v31 }
 0x233   :  { %1064 = dma.done.wait [#allocation4], 2048  }
 0x234   :  { %1065 = vsyncadd [#allocation4], 4294965248 }
 0x235   :  { %952 = vsyncpa [#allocation3], 1 }
 0x236   :  { %953 = vsyncpa [#allocation6], 1 }
 0x237   :  { %954 = vsyncpa [#allocation4], 1 }

</bundles_post_ra>
